<compile_context>
chip_gen: v7x
topology: tpu7x:2x2x1
jax: 0.10.0
libtpu: 0.0.40
codegen_flags: <defaults>
</compile_context>

<pallas_src>
import functools

import jax
import jax.numpy as jnp
from jax.experimental import pallas as pl
from jax.experimental.pallas import tpu as pltpu


_VMEM_LIMIT_BYTES = 48 * 1024 * 1024        # safe on v5e/v6e (128 MiB) and v7x (64 MiB)
_PIPELINE_VMEM_BUDGET = 40 * 1024 * 1024    # headroom under the limit for the pipeline


def _round_up(x, m):
    return ((x + m - 1) // m) * m


def _choose_tm(m, tm_max, d_in, h_p, w_bytes):
    """Pick the row tile: as big as possible, VMEM-safe, >=2 grid steps when M allows."""
    # double-buffered f32 x-tile + double-buffered f32 out-tile, per row of tm
    per_row = 2 * 4 * d_in + 2 * 4 * h_p
    avail = _PIPELINE_VMEM_BUDGET - 2 * w_bytes - 2 * 4 * h_p
    tm_vmem = max(8, (avail // per_row) // 8 * 8)
    tm = max(8, min(tm_max, tm_vmem, _round_up(m, 8)))
    # v7x megacore: keep at least 2 steps on the 'parallel' axis when M is big enough.
    if m > 8 and pl.cdiv(m, tm) < 2:
        tm = _round_up(pl.cdiv(m, 2), 8)
    return tm


def _txtnet_proj_kernel(x_ref, w_ref, b_ref, o_ref, *, nonlinear, matmul_dtype):
    # x_ref: (tm, D_in) f32 tile   w_ref: (D_in, Hp) bf16 (resident)
    # b_ref: (1, Hp)  f32          o_ref: (tm, Hp)  f32 tile
    x = x_ref[...]
    if nonlinear:
        # ReLU in f32 (v5e's VPU has no bf16 ALU); only the MXU operands get cast.
        x = jnp.maximum(x, 0.0)
    acc = jnp.dot(x.astype(matmul_dtype), w_ref[...],
                  preferred_element_type=jnp.float32)      # bf16 in, f32 accumulate (MXU)
    o_ref[...] = (acc + b_ref[...]).astype(o_ref.dtype)


def txtnet_emb_proj(last_hidden_state, weight, bias, *, tm=512, nonlinear=True,
                    matmul_dtype=jnp.bfloat16):
    """Pallas implementation of TxtNet.emb_proj.

    last_hidden_state: [B, S, D_in]  float32
    weight:            [D_in, H]     float32  (transposed vs. torch's [H, D_in])
    bias:              [H]           float32
    returns:           [B, S, H]     float32
    """
    B, S, D_in = last_hidden_state.shape
    H = weight.shape[1]
    M = B * S

    # Lane-dense output: pad H up to a multiple of 128 (avoids masked vst.msk stores).
    Hp = _round_up(H, 128)
    w = weight.astype(matmul_dtype)
    b = bias.astype(jnp.float32)
    if Hp != H:
        w = jnp.pad(w, ((0, 0), (0, Hp - H)))
        b = jnp.pad(b, (0, Hp - H))

    x2d = last_hidden_state.reshape(M, D_in)
    b2d = b.reshape(1, Hp)

    w_bytes = D_in * Hp * jnp.dtype(matmul_dtype).itemsize
    tm_eff = _choose_tm(M, tm, D_in, Hp, w_bytes)
    grid = (pl.cdiv(M, tm_eff),)

    cost = pl.CostEstimate(
        flops=2 * M * D_in * Hp,
        transcendentals=0,
        bytes_accessed=M * D_in * 4 + M * Hp * 4 + w_bytes + Hp * 4,
    )

    kernel = functools.partial(_txtnet_proj_kernel,
                               nonlinear=nonlinear, matmul_dtype=matmul_dtype)

    out2d = pl.pallas_call(
        kernel,
        out_shape=jax.ShapeDtypeStruct((M, Hp), last_hidden_state.dtype),
        grid_spec=pltpu.PrefetchScalarGridSpec(
            num_scalar_prefetch=0,
            grid=grid,
            in_specs=[
                pl.BlockSpec((tm_eff, D_in), lambda i: (i, 0)),  # hidden-state row tile
                pl.BlockSpec((D_in, Hp), lambda i: (0, 0)),      # full bf16 weight, resident
                pl.BlockSpec((1, Hp), lambda i: (0, 0)),         # bias, resident
            ],
            out_specs=pl.BlockSpec((tm_eff, Hp), lambda i: (i, 0)),
        ),
        compiler_params=pltpu.CompilerParams(
            dimension_semantics=("parallel",),
            vmem_limit_bytes=_VMEM_LIMIT_BYTES,
        ),
        cost_estimate=cost,
    )(x2d, w, b2d)

    if Hp != H:
        out2d = out2d[:, :H]
    return out2d.reshape(B, S, H)


# TODO(synk): GPT2 tokenization/encoding and TextGrid parsing in TxtNet.forward have no
# Pallas equivalent (external tokenizer / frozen pretrained model / pickled data); the
# kernel starts from `last_hidden_state`.


if __name__ == "__main__":
    # Small shapes consistent with the module:
    #   bs = 2 (self.bs), seq = 8 tokens, input_size = 256 (GPT2 hidden, shrunk),
    #   hidden_size (latent_dim) = 128.
    B, S, D_IN, H = 2, 8, 256, 128

    key = jax.random.PRNGKey(0)
    k_x, k_w, k_b = jax.random.split(key, 3)

    last_hidden_state = jax.random.normal(k_x, (B, S, D_IN), dtype=jnp.float32)
    # torch nn.Linear(in, out): weight [out, in]; we store it transposed [in, out].
    bound = 1.0 / (D_IN ** 0.5)
    weight = jax.random.uniform(k_w, (D_IN, H), minval=-bound, maxval=bound, dtype=jnp.float32)
    bias = jax.random.uniform(k_b, (H,), minval=-bound, maxval=bound, dtype=jnp.float32)

    out = txtnet_emb_proj(last_hidden_state, weight, bias, nonlinear=True)
    out = jax.block_until_ready(out)

    # Pure-JAX f32 reference (ReLU -> Linear). Kernel uses bf16 MXU operands with f32
    # accumulation, so tolerance is loosened accordingly.
    ref = jnp.maximum(last_hidden_state, 0.0) @ weight + bias
    assert out.shape == (B, S, H)
    assert jnp.allclose(out, ref, atol=2e-2, rtol=2e-2), "mismatch vs reference"

    print("KERNEL_OK")
</pallas_src>

<mosaic_0001>
module attributes {stable_mosaic.version = 11 : i64} {
  func.func @_txtnet_proj_kernel(%arg0: i32, %arg1: memref<8x256xf32, #tpu.memory_space<vmem>>, %arg2: memref<256x128xbf16, #tpu.memory_space<vmem>>, %arg3: memref<1x128xf32, #tpu.memory_space<vmem>>, %arg4: memref<8x128xf32, #tpu.memory_space<vmem>>) attributes {dimension_semantics = [#tpu.dimension_semantics<parallel>], iteration_bounds = array<i64: 2>, scalar_prefetch = 0 : i64, scratch_operands = 0 : i64, tpu.core_type = #tpu.core_type<tc>, window_params = [{transform_indices = @transform_0, window_bounds = array<i64: 8, 256>}, {pipeline_mode = #tpu.pipeline_mode<synchronous>, transform_indices = @transform_1, window_bounds = array<i64: 256, 128>}, {pipeline_mode = #tpu.pipeline_mode<synchronous>, transform_indices = @transform_2, window_bounds = array<i64: 1, 128>}, {transform_indices = @transform_3, window_bounds = array<i64: 8, 128>}]} {
    %c0 = arith.constant 0 : index
    %c0_0 = arith.constant 0 : index
    %0 = vector.load %arg1[%c0, %c0_0] : memref<8x256xf32, #tpu.memory_space<vmem>>, vector<8x256xf32>
    %cst = arith.constant 0.000000e+00 : f32
    %1 = vector.broadcast %cst : f32 to vector<8x256xf32>
    %2 = arith.maximumf %0, %1 : vector<8x256xf32>
    %3 = arith.truncf %2 : vector<8x256xf32> to vector<8x256xbf16>
    %c0_1 = arith.constant 0 : index
    %c0_2 = arith.constant 0 : index
    %4 = vector.load %arg2[%c0_1, %c0_2] : memref<256x128xbf16, #tpu.memory_space<vmem>>, vector<256x128xbf16>
    %cst_3 = arith.constant dense<0.000000e+00> : vector<8x128xf32>
    %5 = tpu.matmul %3, %4, %cst_3 {dimension_numbers = #tpu.dot_dimension_numbers<[1], [0], [0], [1], [0, 0, 1, 1], [], []>} : vector<8x256xbf16>, vector<256x128xbf16>, vector<8x128xf32> -> vector<8x128xf32>
    %c0_4 = arith.constant 0 : index
    %c0_5 = arith.constant 0 : index
    %6 = vector.load %arg3[%c0_4, %c0_5] : memref<1x128xf32, #tpu.memory_space<vmem>>, vector<1x128xf32>
    %7 = vector.broadcast %6 : vector<1x128xf32> to vector<8x128xf32>
    %8 = arith.addf %5, %7 : vector<8x128xf32>
    %c0_6 = arith.constant 0 : index
    %c0_7 = arith.constant 0 : index
    %9 = vector.load %arg4[%c0_6, %c0_7] : memref<8x128xf32, #tpu.memory_space<vmem>>, vector<8x128xf32>
    tpu.vector_store %arg4[%c0_6, %c0_7], %8 {strides = array<i32>} : memref<8x128xf32, #tpu.memory_space<vmem>>, vector<8x128xf32>,
    return
  }
  func.func @transform_0(%arg0: i32) -> (i32, i32) {
    %c0_i32 = arith.constant 0 : i32
    %c0_i32_0 = arith.constant 0 : i32
    return %arg0, %c0_i32 : i32, i32
  }
  func.func @transform_1(%arg0: i32) -> (i32, i32) {
    %c0_i32 = arith.constant 0 : i32
    %c0_i32_0 = arith.constant 0 : i32
    %c0_i32_1 = arith.constant 0 : i32
    return %c0_i32, %c0_i32_0 : i32, i32
  }
  func.func @transform_2(%arg0: i32) -> (i32, i32) {
    %c0_i32 = arith.constant 0 : i32
    %c0_i32_0 = arith.constant 0 : i32
    %c0_i32_1 = arith.constant 0 : i32
    return %c0_i32, %c0_i32_0 : i32, i32
  }
  func.func @transform_3(%arg0: i32) -> (i32, i32) {
    %c0_i32 = arith.constant 0 : i32
    %c0_i32_0 = arith.constant 0 : i32
    return %arg0, %c0_i32 : i32, i32
  }
}

</mosaic_0001>

<bundles_post_ra>
// kernel: tpu_custom_call.1
= control target key start
LH: loop header
LB: loop body
LE: loop exit
PB: predicated region body
PF: predicated region fallthrough
CT: control target
= control target key end

     0   :  { %8 = vsyncpa [#allocation3], 0  ;;  %s968_s0 = inlined_call_operand.hbm [shape: f32[16,256], index: 0, kind: input, shape index: {}]   ;;  %s969_s1 = inlined_call_operand.hbm [shape: bf16[256,128], index: 1, kind: input, shape index: {}]   ;;  %s970_s2 = inlined_call_operand.vmem [shape: f32[1,128], index: 2, kind: input, shape index: {}]   ;;  %s971_s3 = inlined_call_operand.hbm [shape: f32[16,128], index: 3, kind: output, shape index: {}]  }
   0x1   :  { %10 = vsyncpa [#allocation3 + $0x1], 0 }
   0x2   :  { %11 = vsyncpa [#allocation6], 0 }
   0x3   :  { %12 = vsyncpa [#allocation4], 0 }
   0x4   :  { %14 = vsyncpa [#allocation4 + $0x1], 0  ;;  %s764_s12 = smov 0   ;;  %s766_s13 = smov 0  }
   0x5   :  { %s768_s14 = smov 0   ;;  %s770_s15 = smov 0  }
   0x6 LB: > { %s785_s16 = sadd.s32 4294967295, %s737_s15   ;;  %s479_s17 = sadd.s32 4294967294, %s737_s15   ;;  %s737_s15 = sphi %s770_s15, %s991_s15   ;;  %s733_s14 = sphi %s768_s14, %s990_s14   ;;  %s729_s13 = sphi %s766_s13, %s989_s13   ;;  %s725_s12 = sphi %s764_s12, %s988_s12  }
   0x7   : > { %p40_p0 = scmp.ne.s32.totalorder %s729_s13, %s725_s12  ;;  %p972_p1 = scmp.eq.s32.totalorder %s785_s16, 0 }
   0x8   : > { %p112_p3 = scmp.eq.s32.totalorder %s479_s17, 1  ;;  %p480_p5 = scmp.ge.s32.totalorder %s737_s15, 1 }
   0x9   : > { %p794_p4 = por %p972_p1, %p40_p0  ;;  %p119_p7 = scmp.lt.s32.totalorder %s737_s15, 3 }
   0xa   : > { %p799_p6 = por %p112_p3, %p40_p0  ;;  %s739_s21 = smov [#allocation5]  }
   0xb   : > { %s975_s18 = scalar_select %p794_p4, 1, 0 }
   0xc   : > { %s976_s19 = scalar_select %p799_p6, 1, 0 }
   0xd   : > { %p804_p8 = pnand %p480_p5, %p119_p7  ;;  %s131_s22 = sshll.u32 %s739_s21, 4  ;;  %s808_s22 = int_to_ptr.vmem [resolvable:$true] %s131_s22 }
   0xe   : > { %s820_s24 = sadd.s32 1, %s737_s15   ;;  %s27_s25 = sadd.s32 1, %s733_s14 }
   0xf   : > { %s977_s20 = scalar_select %p804_p8, 1, 0 }
  0x10   : > { %p542_p9 = pneg %p804_p8  ;;  %s24_s26 = ssub.s32 %s737_s15, %s820_s24 }
  0x11   : > { %s609_s29 = scalar_lea.hbm %s969_s1, 2048 }
  0x12   : > { %p815_p11 = pnand %p542_p9, %p972_p1  ;;  %p610_p12 = scmp.ne.s32.totalorder %s969_s1, %s609_s29 }
  0x13   : > { %p616_p5 = scmp.lt.u32.totalorder %s609_s29, %s969_s1 }
  0x14   : > { %p611_p13 = pneg %p815_p11 }
  0x16   : > { %p612_p0 = pnand %p611_p13, %p610_p12 }
  0x18   : > { %p613_p3 = pneg %p612_p0 }
  0x1a   : > { %p618_p7 = pnand %p616_p5, %p613_p3 }
  0x1c   : > { %621 = shalt.err (!%p618_p7)
}
  0x1d   : > { %s622_s7 = scalar_lea.vmem %s808_s22, 2048  ;;  %p630_p2 = scmp.lt.s32.totalorder %s808_s22, %s808_s22 }
  0x1e   : > { %p623_p9 = scmp.ne.s32.totalorder %s808_s22, %s622_s7  ;;  %p631_p6 = scmp.lt.s32.totalorder %s622_s7, %s622_s7 }
  0x20   : > { %p625_p10 = pnand %p623_p9, %p611_p13  ;;  %p632_p4 = por %p631_p6, %p630_p2 }
  0x22   : > { %p626_p1 = pneg %p625_p10 }
  0x24   : > { %p633_p8 = pnand %p632_p4, %p626_p1 }
  0x26   : > { %636 = shalt.err (!%p633_p8)
}
  0x27   : > { %s740_s8 = smov 64   ;;  %s741_s9 = smov 4  }
  0x28   : > { %545 = dma.hbm_to_vmem [thread:$0]  (!%p815_p11), %s969_s1, 2048, %s808_s22, [#allocation6], %s740_s8, %s740_s8, %s741_s9  }
  0x29   : > { %p25_p2 = scmp.eq.s32.totalorder %s24_s26, 0  ;;  %p34_p1 = scmp.ne.s32.totalorder %s733_s14, %s729_s13 }
  0x2a   : > { %p35_p4 = scmp.eq.s32.totalorder %s737_s15, 0  ;;  %p555_p6 = scmp.lt.s32.totalorder %s737_s15, 2 }
  0x2b   : > { %s851_s17 = scalar_select %p25_p2, %s733_s14, %s27_s25  }
  0x2c   : > { %p36_p8 = por %p35_p4, %p34_p1  ;;  %p979_p10 = scmp.eq.s32.totalorder %s785_s16, 1 }
  0x2d   : > { %s148_s27 = sand.u32 1, %s733_s14   ;;  %s511_s28 = sshll.u32 %s737_s15, 8 }
  0x2e   : > { %p855_p12 = por %p979_p10, %p34_p1  ;;  %s483_s29 = sshll.u32 %s148_s27, 4 }
  0x2f   : > { %s864_s4 = scalar_lea.hbm %s968_s0, %s511_s28  ;;  %s152_s22 = scalar_lea.vmem [#allocation2], %s483_s29 }
  0x30   : > { %s160_s25 = sshll.u32 %s152_s22, 4  ;;  %p866_p11 = pnand %p555_p6, %p36_p8  ;;  %s870_s25 = int_to_ptr.vmem [resolvable:$true] %s160_s25 }
  0x31   : > { %s149_s5 = scalar_lea.sflag [#allocation3], %s148_s27  ;;  %s637_s6 = scalar_lea.hbm %s864_s4, 256 }
  0x32   : > { %p638_p13 = scmp.ne.s32.totalorder %s864_s4, %s637_s6  ;;  %p639_p0 = pneg %p866_p11 }
  0x33   : > { %s642_s9 = scalar_lea.hbm %s968_s0, 512  ;;  %p643_p7 = scmp.lt.u32.totalorder %s864_s4, %s968_s0 }
  0x34   : > { %p640_p3 = pnand %p639_p0, %p638_p13  ;;  %p644_p9 = scmp.lt.u32.totalorder %s642_s9, %s637_s6 }
  0x35   : > { %p646_p1 = scmp.lt.u32.totalorder %s637_s6, %s864_s4 }
  0x36   : > { %p641_p5 = pneg %p640_p3  ;;  %p645_p2 = por %p644_p9, %p643_p7 }
  0x38   : > { %p647_p4 = por %p646_p1, %p645_p2 }
  0x3a   : > { %p648_p6 = pnand %p647_p4, %p641_p5 }
  0x3c   : > { %651 = shalt.err (!%p648_p6)
}
  0x3d   : > { %s652_s27 = scalar_lea.vmem %s870_s25, 256  ;;  %s742_s28 = smov [#allocation2]  }
  0x3e   : > { %p653_p8 = scmp.ne.s32.totalorder %s870_s25, %s652_s27  ;;  %s657_s29 = sshll.u32 %s742_s28, 4  ;;  %s658_s29 = int_to_ptr.vmem [resolvable:$false] %s657_s29 }
  0x3f   : > { %s659_s23 = scalar_lea.vmem %s658_s29, 512  ;;  %p660_p3 = scmp.lt.s32.totalorder %s870_s25, %s658_s29 }
  0x40   : > { %p655_p10 = pnand %p653_p8, %p639_p0  ;;  %p661_p7 = scmp.lt.s32.totalorder %s659_s23, %s652_s27 }
  0x42   : > { %p656_p13 = pneg %p655_p10  ;;  %p662_p9 = por %p661_p7, %p660_p3 }
  0x44   : > { %p663_p2 = pnand %p662_p9, %p656_p13 }
  0x46   : > { %666 = shalt.err (!%p663_p2)
}
  0x47   : > { %549 = dma.hbm_to_vmem [thread:$0]  (!%p866_p11), %s864_s4, 256, %s870_s25, %s149_s5  }
  0x48   : > { %p982_p5 = scmp.ne.s32.totalorder %s977_s20, 0 }
  0x49   : > { %s900_s30 = sand.u32 (!%p982_p5), 1, %s729_s13   ;;  %p983_p0 = scmp.ne.s32.totalorder (!%p982_p5), %s975_s18, 0 }
  0x4a   : > { %169 = sbr.rel (%p982_p5) target bundleno = 349 (0x15d), region = 32  ;;  %s487_s22 = sshll.u32 (!%p982_p5), %s900_s30, 4 }
  0x4b   : > { %s172_s6 = scalar_lea.sflag (!%p982_p5), [#allocation3], %s900_s30  ;;  %s904_s7 = scalar_lea.vmem (!%p982_p5), [#allocation2], %s487_s22 }
  0x51   : > { %712 = dma.done.wait (%p983_p0), %s172_s6, 256  }
  0x52   : > { %714 = vsyncadd (%p983_p0), %s172_s6, 4294967040  ;;  %p984_p11 = scmp.eq.s32.totalorder %s785_s16, 0 }
  0x54   : > { %716 = dma.done.wait (%p984_p11), [#allocation6], 2048   ;;  %p985_p1 = pmov %p984_p11 }
  0x55   : > { %v593_v0 = vld [vmem:[#allocation5 + $0x40] sm:$0xff]   ;;  %v595_v2 = vld [vmem:[#allocation5 + $0x48] sm:$0xff]   ;;  %v597_v4 = vld [vmem:[#allocation5 + $0x50] sm:$0xff]   ;;  %s489_s18 = sshll.u32 %s900_s30, 3  ;;  %s508_s25 = sshll.u32 %s785_s16, 7 }
  0x56   : > { %718 = vsyncadd (%p985_p1), [#allocation6], 4294965248  ;;  %v594_v1 = vld [vmem:[#allocation5] sm:$0xff]   ;;  %512 = vmatprep.subr.bf16.mxu0 %v593_v0  ;;  %v596_v3 = vld [vmem:[#allocation5 + $0x8] sm:$0xff]   ;;  %s201_s26 = scalar_lea.vmem [#allocation7], %s489_s18  ;;  %s924_s10 = scalar_lea.hbm %s971_s3, %s508_s25 }
  0x57   : > { %513 = vmatpush3.bf16.msra.mxu0 %v594_v1  ;;  %v598_v5 = vld [vmem:[#allocation5 + $0x10] sm:$0xff]   ;;  %v599_v6 = vld [vmem:[#allocation5 + $0x58] sm:$0xff]   ;;  %v601_v8 = vld [vmem:[#allocation5 + $0x60] sm:$0xff]   ;;  %s399_s5 = sshll.u32 %s201_s26, 4  ;;  %s386_s11 = scalar_lea.sflag [#allocation4], %s900_s30  ;;  %s926_s5 = int_to_ptr.vmem [resolvable:$true] %s399_s5 }
  0x58   : > { %514 = vmatprep.subr.bf16.mxu0 %v595_v2  ;;  %v600_v7 = vld [vmem:[#allocation5 + $0x18] sm:$0xff]   ;;  %v602_v9 = vld [vmem:[#allocation5 + $0x20] sm:$0xff]   ;;  %v603_v10 = vld [vmem:[#allocation5 + $0x68] sm:$0xff]   ;;  %s667_s27 = scalar_lea.vmem %s926_s5, 128  ;;  %s743_s16 = smov [#allocation7]  }
  0x59   : > { %v204_v11 = vld [vmem:[%s904_s7 + $0x8] sm:$0xff]  ;;  %v605_v15 = vld [vmem:[#allocation5 + $0x70] sm:$0xff]   ;;  %v490_v23 = vld [vmem:[%s970_s2] ss:$0 sm:$0xff]  ;;  %p668_p4 = scmp.ne.s32.totalorder %s926_s5, %s667_s27  ;;  %s671_s28 = sshll.u32 %s743_s16, 4  ;;  %s672_s28 = int_to_ptr.vmem [resolvable:$false] %s671_s28 }
  0x5a   : > { %v206_v12 = vmax.f32 %v204_v11, 0.0  ;;  %v604_v13 = vld [vmem:[#allocation5 + $0x28] sm:$0xff]   ;;  %v606_v16 = vld [vmem:[#allocation5 + $0x30] sm:$0xff]   ;;  %v607_v18 = vld [vmem:[#allocation5 + $0x78] sm:$0xff]   ;;  %s673_s29 = scalar_lea.vmem %s672_s28, 256  ;;  %p674_p10 = scmp.lt.s32.totalorder %s926_s5, %s672_s28 }
  0x5b   : > { %515 = vmatpush3.bf16.msra.mxu0 %v596_v3  ;;  %v203_v17 = vld [vmem:[%s904_s7] sm:$0xff]  ;;  %v608_v20 = vld [vmem:[#allocation5 + $0x38] sm:$0xff]   ;;  %p669_p6 = pnand %p668_p4, %p855_p12  ;;  %p675_p13 = scmp.lt.s32.totalorder %s673_s29, %s667_s27 }
  0x5c   : > { %516 = vmatprep.subr.bf16.mxu0 %v597_v4  ;;  %v208_v14 = vpack.c.bf16 %v206_v12, %v206_v12  ;;  %v205_v19 = vmax.f32 %v203_v17, 0.0 }
  0x5d   : > { %p670_p8 = pneg %p669_p6  ;;  %p676_p3 = por %p675_p13, %p674_p10 }
  0x5e   : > { %376 = vmatprep.mubr.bf16.mxu0 %v208_v14  ;;  %v207_v21 = vpack.c.bf16 %v205_v19, %v205_v19 }
  0x5f   : > { %517 = vmatpush3.bf16.msra.mxu0 %v598_v5  ;;  %p677_p7 = pnand %p676_p3, %p670_p8 }
  0x60   : > { %518 = vmatprep.subr.bf16.mxu0 %v599_v6 }
  0x63   : > { %519 = vmatpush3.bf16.msra.mxu0 %v600_v7 }
  0x64   : > { %520 = vmatprep.subr.bf16.mxu0 %v601_v8 }
  0x67   : > { %521 = vmatpush3.bf16.msra.mxu0 %v602_v9 }
  0x68   : > { %522 = vmatprep.subr.bf16.mxu0 %v603_v10 }
  0x6b   : > { %523 = vmatpush3.bf16.msra.mxu0 %v604_v13 }
  0x6c   : > { %524 = vmatprep.subr.bf16.mxu0 %v605_v15 }
  0x6f   : > { %525 = vmatpush3.bf16.msra.mxu0 %v606_v16 }
  0x70   : > { %526 = vmatprep.subr.bf16.mxu0 %v607_v18 }
  0x73   : > { %527 = vmatpush3.bf16.msra.mxu0 %v608_v20 }
  0x76   : > { %377 = vmatmul.mubr.bf16.vlgmr.msra.gmra.mrb[0].mxu0 %v207_v21 }
 0x149   : > { %v528_v22 = vpop.f32.mrb[0].mxu0 }
 0x14a   : > { %v529_v24 = vpop.f32.mrb[1].mxu0 }
 0x14b   : > { %v530_v25 = vadd.f32 %v529_v24, %v528_v22  ;;  %v531_v26 = vpop.f32.mrb[2].mxu0 }
 0x14c   : > { %v532_v27 = vpop.f32.mrb[3].mxu0 }
 0x14d   : > { %v379_v28 = vadd.f32 %v530_v25, %v490_v23 }
 0x14f   : > { %384 = vst [vmem:[%s201_s26] sm:$0xff] %v379_v28 }
 0x150   : > { %680 = shalt.err (!%p677_p7)
}
 0x151   : > { %s681_s23 = scalar_lea.hbm %s924_s10, 128  ;;  %s685_s6 = scalar_lea.hbm %s971_s3, 256 }
 0x152   : > { %p682_p9 = scmp.ne.s32.totalorder %s924_s10, %s681_s23  ;;  %p686_p0 = scmp.lt.u32.totalorder %s924_s10, %s971_s3 }
 0x153   : > { %p687_p11 = scmp.lt.u32.totalorder %s685_s6, %s681_s23  ;;  %p689_p4 = scmp.lt.u32.totalorder %s681_s23, %s924_s10 }
 0x154   : > { %p683_p2 = pnand %p682_p9, %p855_p12 }
 0x155   : > { %p688_p1 = por %p687_p11, %p686_p0 }
 0x156   : > { %p684_p5 = pneg %p683_p2 }
 0x157   : > { %p690_p6 = por %p689_p4, %p688_p1 }
 0x159   : > { %p691_p8 = pnand %p690_p6, %p684_p5 }
 0x15b   : > { %694 = shalt.err (!%p691_p8)
}
 0x15c   : > { %540 = dma.vmem_to_hbm [thread:$0]  (%p855_p12), %s926_s5, 128, %s924_s10, %s386_s11  }
 0x15d PF: > { %s411_s20 = sand.u32 1, %s725_s12   ;;  %p986_p10 = scmp.ne.s32.totalorder %s976_s19, 0 }
 0x15e   : > { %p987_p13 = scmp.ge.s32.totalorder %s737_s15, 2  ;;  %s412_s4 = scalar_lea.sflag [#allocation4], %s411_s20 }
 0x160   : > { %p551_p3 = pnand %p987_p13, %p986_p10 }
 0x162   : > { %720 = dma.done.wait (!%p551_p3), %s412_s4, 128  }
 0x163   : > { %722 = vsyncadd (!%p551_p3), %s412_s4, 4294967168  ;;  %p17_p7 = scmp.ge.s32.totalorder %s820_s24, 4   ;;  %s988_s12 = smov %s729_s13 }
 0x164   : > { %s989_s13 = smov %s733_s14  ;;  %s990_s14 = smov %s851_s17 }
 0x165   : > { %s991_s15 = smov %s820_s24  ;;  %19 = sbr.rel (!%p17_p7) target bundleno = 6 (0x6), region = 81 }
 0x16c   :  { %417 = vsyncpa [#allocation3], 1 }
 0x16d   :  { %419 = vsyncpa [#allocation3 + $0x1], 1 }
 0x16e   :  { %420 = vsyncpa [#allocation6], 1 }
 0x16f   :  { %421 = vsyncpa [#allocation4], 1 }
 0x170   :  { %423 = vsyncpa [#allocation4 + $0x1], 1 }

</bundles_post_ra>
